<compile_context>
chip_gen: v7x
topology: tpu7x:2x2x1
jax: 0.10.0
libtpu: 0.0.40
codegen_flags: <defaults>
</compile_context>

<pallas_src>
import jax
import jax.numpy as jnp
from jax.experimental import pallas as pl
from jax.experimental.pallas import tpu as pltpu


def _concat_copy_kernel(edge_ref, new_ref, out_ref):
    """out[rb, E_out] = concat(edge[rb, E], new[rb, n_new]) along the lane axis.

    Pure memory movement: one lane concat, one full-block store.
    """
    out_ref[...] = jnp.concatenate([edge_ref[...], new_ref[...]], axis=-1)


def _new_edge_block(T, t, dtype, bidirectional):
    """Batch-invariant (2, n_new) block of temporal edges."""
    a = jnp.arange(t, dtype=dtype) + jnp.asarray(T, dtype=dtype)   # arange(T, T+t)
    b = a + jnp.asarray(1, dtype=dtype)                            # arange(T+1, T+t+1)
    blk = jnp.stack((b, a))                                        # (2, t): back edge t -> t-1
    if bidirectional:
        blk = jnp.concatenate([blk, jnp.stack((a, b))], axis=-1)   # (2, 2t)
    return blk


def temporal_edge_forward(nodes, edge_list, weights, B, T, t, num_hops=1,
                          bidirectional=False, min_pallas_elems=1 << 14,
                          force_pallas=False):
    """JAX/Pallas equivalent of TemporalEdge.forward.

    nodes      : unused (kept for signature parity with the PyTorch module)
    edge_list  : (B, 2, E) integer edge list
    weights    : returned untouched
    B, t       : static Python ints; T may be a Python int or a traced scalar
    """
    del nodes  # only used for .device in the PyTorch module
    assert num_hops == 1, "Not yet implemented"
    Bq, two, E = edge_list.shape
    assert Bq == B and two == 2
    dtype = edge_list.dtype

    n_new = t * (2 if bidirectional else 1)
    E_out = E + n_new

    new_block = _new_edge_block(T, t, dtype, bidirectional)        # (2, n_new)

    # Degenerate or tiny shapes: a fused XLA concatenate beats any kernel launch.
    tiny = (2 * B * E_out) < min_pallas_elems
    if E == 0 or n_new == 0 or (tiny and not force_pallas):
        all_edges = jnp.concatenate(
            [edge_list, jnp.broadcast_to(new_block[None], (B, 2, n_new))], axis=-1)
        return all_edges, weights

    # ---- Pallas path: sublane-dense (B*2, E) layout, pure concat-copy. ----
    R = 2 * B
    edges_flat = edge_list.reshape(R, E)
    new_flat = jnp.broadcast_to(new_block[None], (B, 2, n_new)).reshape(R, n_new)

    # Row-block size from a conservative VMEM budget (double-buffered in + out),
    # so tiles stay within the v7x 64 MiB VMEM / 32 MiB scoped default while
    # staying large enough to sit near the HBM roofline.  When there is enough
    # work, keep >= 2 grid steps so both v7x TensorCores get a share.
    vmem_data_budget = 12 * 1024 * 1024
    bytes_per_row = (E + n_new + E_out) * dtype.itemsize * 2
    rb = vmem_data_budget // max(1, bytes_per_row)
    if rb >= R:
        rb = R
        if R >= 16:
            rb = ((((R + 1) // 2) + 7) // 8) * 8     # ~2 blocks, multiple of 8
    else:
        rb = max(8, (rb // 8) * 8)                   # (8, 128) tiling rule

    grid = (pl.cdiv(R, rb),)
    all_edges_flat = pl.pallas_call(
        _concat_copy_kernel,
        out_shape=jax.ShapeDtypeStruct((R, E_out), dtype),
        grid=grid,
        in_specs=[
            pl.BlockSpec((rb, E), lambda i: (i, 0)),
            pl.BlockSpec((rb, n_new), lambda i: (i, 0)),
        ],
        out_specs=pl.BlockSpec((rb, E_out), lambda i: (i, 0)),
        compiler_params=pltpu.CompilerParams(
            dimension_semantics=("parallel",)),
    )(edges_flat, new_flat)

    return all_edges_flat.reshape(B, 2, E_out), weights


def _reference(edge_list, weights, B, T, t, bidirectional=False):
    """Pure-JAX reference mirroring the PyTorch code."""
    a = jnp.arange(T, T + t, dtype=edge_list.dtype)
    b = jnp.arange(T + 1, T + t + 1, dtype=edge_list.dtype)
    new_edges = jnp.broadcast_to(jnp.stack((b, a)), (B, 2, t))
    if bidirectional:
        out_edge = jnp.broadcast_to(jnp.stack((a, b)), (B, 2, t))
        new_edges = jnp.concatenate((new_edges, out_edge), axis=-1)
    all_edges = jnp.concatenate((edge_list, new_edges), axis=-1)
    return all_edges, weights


if __name__ == "__main__":
    key = jax.random.PRNGKey(0)
    k1, k2, k3, k4 = jax.random.split(key, 4)

    # ---- small shapes consistent with the module's forward ----
    B, T, t, E, H = 2, 8, 4, 6, 32
    nodes = jax.random.normal(k1, (B, T + t + 1, H), dtype=jnp.float32)
    edge_list = jax.random.randint(k2, (B, 2, E), 0, T + t, dtype=jnp.int32)
    weights = jax.random.normal(k3, (B, E), dtype=jnp.float32)

    # Pallas path (forced, since these shapes are below the dispatch threshold)
    all_edges, w_out = temporal_edge_forward(
        nodes, edge_list, weights, B, T, t, bidirectional=False,
        force_pallas=True)
    jax.block_until_ready(all_edges)
    ref_edges, _ = _reference(edge_list, weights, B, T, t, bidirectional=False)
    assert all_edges.shape == (B, 2, E + t)
    assert jnp.array_equal(all_edges, ref_edges)
    assert jnp.array_equal(w_out, weights)

    # Pallas path -- bidirectional variant
    all_edges_bi, _ = temporal_edge_forward(
        nodes, edge_list, weights, B, T, t, bidirectional=True,
        force_pallas=True)
    jax.block_until_ready(all_edges_bi)
    ref_edges_bi, _ = _reference(edge_list, weights, B, T, t, bidirectional=True)
    assert all_edges_bi.shape == (B, 2, E + 2 * t)
    assert jnp.array_equal(all_edges_bi, ref_edges_bi)

    # Auto-dispatch path (tiny shapes -> fused XLA concat), must still match.
    all_edges_auto, _ = temporal_edge_forward(
        nodes, edge_list, weights, B, T, t, bidirectional=False)
    assert jnp.array_equal(all_edges_auto, ref_edges)

    # A moderately larger case exercising the row grid (R=16 -> 2 row blocks).
    B2, T2, t2, E2 = 8, 32, 16, 512
    nodes2 = jnp.zeros((B2, T2 + t2 + 1, H), dtype=jnp.float32)
    edge_list2 = jax.random.randint(k4, (B2, 2, E2), 0, T2 + t2, dtype=jnp.int32)
    weights2 = jnp.ones((B2, E2), dtype=jnp.float32)
    out2, _ = temporal_edge_forward(
        nodes2, edge_list2, weights2, B2, T2, t2, bidirectional=True,
        force_pallas=True)
    jax.block_until_ready(out2)
    ref2, _ = _reference(edge_list2, weights2, B2, T2, t2, bidirectional=True)
    assert out2.shape == (B2, 2, E2 + 2 * t2)
    assert jnp.array_equal(out2, ref2)

    print("KERNEL_OK")
</pallas_src>

<mosaic_0001>
module attributes {stable_mosaic.version = 11 : i64} {
  func.func @_concat_copy_kernel(%arg0: i32, %arg1: memref<4x6xi32, #tpu.memory_space<vmem>>, %arg2: memref<4x4xi32, #tpu.memory_space<vmem>>, %arg3: memref<4x10xi32, #tpu.memory_space<vmem>>) attributes {dimension_semantics = [#tpu.dimension_semantics<parallel>], iteration_bounds = array<i64: 1>, scalar_prefetch = 0 : i64, scratch_operands = 0 : i64, tpu.core_type = #tpu.core_type<tc>, window_params = [{transform_indices = @transform_0, window_bounds = array<i64: 4, 6>}, {transform_indices = @transform_1, window_bounds = array<i64: 4, 4>}, {transform_indices = @transform_2, window_bounds = array<i64: 4, 10>}]} {
    %c0 = arith.constant 0 : index
    %c0_0 = arith.constant 0 : index
    %0 = vector.load %arg1[%c0, %c0_0] : memref<4x6xi32, #tpu.memory_space<vmem>>, vector<4x6xi32>
    %c0_1 = arith.constant 0 : index
    %c0_2 = arith.constant 0 : index
    %1 = vector.load %arg2[%c0_1, %c0_2] : memref<4x4xi32, #tpu.memory_space<vmem>>, vector<4x4xi32>
    %2 = tpu.concatenate %0, %1 in 1 : vector<4x6xi32>, vector<4x4xi32> -> vector<4x10xi32>
    %c0_3 = arith.constant 0 : index
    %c0_4 = arith.constant 0 : index
    %3 = vector.load %arg3[%c0_3, %c0_4] : memref<4x10xi32, #tpu.memory_space<vmem>>, vector<4x10xi32>
    tpu.vector_store %arg3[%c0_3, %c0_4], %2 {strides = array<i32>} : memref<4x10xi32, #tpu.memory_space<vmem>>, vector<4x10xi32>,
    return
  }
  func.func @transform_0(%arg0: i32) -> (i32, i32) {
    %c0_i32 = arith.constant 0 : i32
    %c0_i32_0 = arith.constant 0 : i32
    return %arg0, %c0_i32 : i32, i32
  }
  func.func @transform_1(%arg0: i32) -> (i32, i32) {
    %c0_i32 = arith.constant 0 : i32
    %c0_i32_0 = arith.constant 0 : i32
    return %arg0, %c0_i32 : i32, i32
  }
  func.func @transform_2(%arg0: i32) -> (i32, i32) {
    %c0_i32 = arith.constant 0 : i32
    %c0_i32_0 = arith.constant 0 : i32
    return %arg0, %c0_i32 : i32, i32
  }
}

</mosaic_0001>

<bundles_post_ra>
// kernel: tpu_custom_call.1
= control target key start
LH: loop header
LB: loop body
LE: loop exit
PB: predicated region body
PF: predicated region fallthrough
CT: control target
= control target key end

     0   :  { %7 = vsyncpa [#allocation3], 0  ;;  %s191_s0 = inlined_call_operand.hbm [shape: s32[4,6], index: 0, kind: input, shape index: {}]   ;;  %s192_s1 = inlined_call_operand.hbm [shape: s32[4,4], index: 1, kind: input, shape index: {}]   ;;  %s193_s2 = inlined_call_operand.hbm [shape: s32[4,10], index: 2, kind: output, shape index: {}]  }
   0x1   :  { %8 = vsyncpa [#allocation6], 0 }
   0x2   :  { %9 = vsyncpa [#allocation4], 0  ;;  %s136_s9 = smov [#allocation2]   ;;  %s137_s11 = smov [#allocation5]  }
   0x3   :  { %s16_s10 = sshll.u32 %s136_s9, 4  ;;  %s26_s12 = sshll.u32 %s137_s11, 4  ;;  %s17_s10 = int_to_ptr.vmem [resolvable:$true] %s16_s10  ;;  %s27_s12 = int_to_ptr.vmem [resolvable:$true] %s26_s12 }
   0x4   :  { %s64_s15 = scalar_lea.hbm %s191_s0, 64 }
   0x5   :  { %p65_p0 = scmp.ne.s32.totalorder %s191_s0, %s64_s15  ;;  %p68_p1 = scmp.lt.u32.totalorder %s64_s15, %s191_s0 }
   0x7   :  { %p70_p2 = pnand %p68_p1, %p65_p0 }
   0x9   :  { %73 = shalt.err (!%p70_p2)
}
   0xa   :  { %s74_s20 = scalar_lea.vmem %s17_s10, 64  ;;  %p79_p4 = scmp.lt.s32.totalorder %s17_s10, %s17_s10 }
   0xb   :  { %p75_p3 = scmp.ne.s32.totalorder %s17_s10, %s74_s20  ;;  %p80_p5 = scmp.lt.s32.totalorder %s74_s20, %s74_s20 }
   0xd   :  { %p81_p6 = por %p80_p5, %p79_p4 }
   0xf   :  { %p82_p7 = pnand %p81_p6, %p75_p3 }
  0x11   :  { %85 = shalt.err (!%p82_p7)
}
  0x12   :  { %19 = dma.hbm_to_vmem [thread:$0]  %s191_s0, 64, %s17_s10, [#allocation3]  }
  0x13   :  { %s86_s25 = scalar_lea.hbm %s192_s1, 64 }
  0x14   :  { %p87_p8 = scmp.ne.s32.totalorder %s192_s1, %s86_s25  ;;  %p90_p9 = scmp.lt.u32.totalorder %s86_s25, %s192_s1 }
  0x16   :  { %p92_p10 = pnand %p90_p9, %p87_p8 }
  0x18   :  { %95 = shalt.err (!%p92_p10)
}
  0x19   :  { %s96_s30 = scalar_lea.vmem %s27_s12, 64  ;;  %p101_p12 = scmp.lt.s32.totalorder %s27_s12, %s27_s12 }
  0x1a   :  { %p97_p11 = scmp.ne.s32.totalorder %s27_s12, %s96_s30  ;;  %p102_p13 = scmp.lt.s32.totalorder %s96_s30, %s96_s30 }
  0x1c   :  { %p103_p0 = por %p102_p13, %p101_p12 }
  0x1e   :  { %p104_p1 = pnand %p103_p0, %p97_p11 }
  0x20   :  { %107 = shalt.err (!%p104_p1)
}
  0x21   :  { %29 = dma.hbm_to_vmem [thread:$0]  %s192_s1, 64, %s27_s12, [#allocation6]  }
  0x22   :  { %130 = dma.done.wait [#allocation3], 64  }
  0x23   :  { %131 = vsyncadd [#allocation3], 4294967232 }
  0x24   :  { %132 = dma.done.wait [#allocation6], 64  }
  0x25   :  { %133 = vsyncadd [#allocation6], 4294967232  ;;  %v37_v0 = vld [vmem:[#allocation5] sm:$0xf]  ;;  %s138_s4 = smov 6   ;;  %s139_s5 = smov [#allocation7]  }
  0x26   :  { %38 = vrot.lane.b32.xlu0 %v37_v0, %s138_s4  ;;  %s50_s6 = sshll.u32 %s139_s5, 4  ;;  %v36_v1 = vld [vmem:[#allocation2] sm:$0xf]  ;;  %vm40_vm0 = vcmask 48128   ;;  %vm42_vm1 = vcmask 76800   ;;  %s51_s6 = int_to_ptr.vmem [resolvable:$true] %s50_s6 }
  0x27   :  { %s108_s7 = scalar_lea.vmem %s51_s6, 64  ;;  %p113_p3 = scmp.lt.s32.totalorder %s51_s6, %s51_s6 }
  0x28   :  { %p109_p2 = scmp.ne.s32.totalorder %s51_s6, %s108_s7  ;;  %p114_p4 = scmp.lt.s32.totalorder %s108_s7, %s108_s7 }
  0x2a   :  { %p115_p5 = por %p114_p4, %p113_p3 }
  0x2c   :  { %p116_p6 = pnand %p115_p5, %p109_p2 }
  0x98   :  { %v39_v2 = vpop.permute.xlu0 %38 }
  0x99   :  { %v41_v3 = vsel %vm40_vm0, %v36_v1, %v39_v2 }
  0x9a   :  { %43 = vst.msk [vmem:[#allocation7] sm:$0xf] %vm42_vm1, %v41_v3 }
  0x9b   :  { %119 = shalt.err (!%p116_p6)
}
  0x9c   :  { %s120_s9 = scalar_lea.hbm %s193_s2, 64 }
  0x9d   :  { %p121_p7 = scmp.ne.s32.totalorder %s193_s2, %s120_s9  ;;  %p124_p8 = scmp.lt.u32.totalorder %s120_s9, %s193_s2 }
  0x9f   :  { %p126_p9 = pnand %p124_p8, %p121_p7 }
  0xa1   :  { %129 = shalt.err (!%p126_p9)
}
  0xa2   :  { %53 = dma.vmem_to_hbm [thread:$0]  %s51_s6, 64, %s193_s2, [#allocation4]  }
  0xa3   :  { %134 = dma.done.wait [#allocation4], 64  }
  0xa4   :  { %135 = vsyncadd [#allocation4], 4294967232 }
  0xa5   :  { %57 = vsyncpa [#allocation3], 1 }
  0xa6   :  { %58 = vsyncpa [#allocation6], 1 }
  0xa7   :  { %59 = vsyncpa [#allocation4], 1 }

</bundles_post_ra>
